<compile_context>
chip_gen: v6e
topology: v6e:2x2x1
jax: 0.10.0
libtpu: 0.0.40
codegen_flags: <defaults>
</compile_context>

<pallas_src>
import functools
import math

import jax
import jax.numpy as jnp
from jax import lax
from jax.experimental import pallas as pl
from jax.experimental.pallas import tpu as pltpu

_LANES = 128
_SUBLANES = 8


def _cdiv(a, b):
    return -(-a // b)


def _min_sublane_rows(dtype):
    """Minimum second-to-last tile dim for the dtype (8 f32, 16 bf16, 32 int8/fp8)."""
    size = jnp.dtype(dtype).itemsize
    if size >= 4:
        return _SUBLANES
    return _SUBLANES * (4 // size)


def _device_kind():
    try:
        return jax.devices()[0].device_kind.lower()
    except Exception:  # pragma: no cover
        return ""


def _mse_partial_kernel(x_ref, t_ref, o_ref, *, rows, tile_rows, chunk_rows,
                        steps, mask_needed):
    """Accumulate per-split partial sums of (x - t)^2 into a resident (1,8,128) output."""
    c = pl.program_id(0)
    i = pl.program_id(1)
    num_chunks = tile_rows // chunk_rows
    block_row0 = (c * steps + i) * tile_rows  # global row index of this block's start

    if mask_needed:
        # Hoisted out of the chunk loop (JAX does not CSE broadcast_in_dim).
        row_iota = lax.broadcasted_iota(jnp.int32, (chunk_rows, _LANES), 0)

    def chunk_body(j, acc):
        r0 = j * chunk_rows
        if not isinstance(r0, int):
            r0 = pl.multiple_of(r0, chunk_rows)
        xc = x_ref[pl.ds(r0, chunk_rows), :].astype(jnp.float32)
        tc = t_ref[pl.ds(r0, chunk_rows), :].astype(jnp.float32)
        d = xc - tc
        sq = d * d
        if mask_needed:
            # Zero the squared diff (not the operands) for rows past the true end,
            # so garbage in partial / clamped edge blocks contributes nothing.
            global_row = row_iota + (block_row0 + r0)
            sq = jnp.where(global_row < rows, sq, 0.0)
        # Fold (chunk_rows,128) down to one (8,128) vreg: pure VPU adds, no XLU.
        return acc + jnp.sum(
            sq.reshape(chunk_rows // _SUBLANES, _SUBLANES, _LANES), axis=0)

    init = jnp.zeros((_SUBLANES, _LANES), jnp.float32)
    if num_chunks == 1:
        acc = chunk_body(0, init)
    else:
        acc = lax.fori_loop(0, num_chunks, chunk_body, init,
                            unroll=min(4, num_chunks))

    @pl.when(i == 0)
    def _():
        o_ref[...] = acc[None]

    @pl.when(i > 0)
    def _():
        o_ref[...] = o_ref[...] + acc[None]


def content_loss_forward(x, target, content_weight, *,
                         num_splits=None, tile_rows_target=None):
    """Returns (output, loss) matching ContentLoss.forward.

    output = x (pass-through);
    loss   = mse(x * cw, target * cw) = cw^2 * mean((x - target)^2).
    `target` is the UNSCALED target (cw^2 is folded into the scalar epilogue).
    """
    assert x.shape == target.shape, "ContentLoss requires matching shapes"
    n_elem = x.size
    kind = _device_kind()
    if num_splits is None:
        # 2-way split only helps on v7x (2 TensorCores); it is a serial re-order
        # elsewhere and just inflates rounding.
        num_splits = 2 if ("v7" in kind or "tpu7" in kind) else 1
    if tile_rows_target is None:
        # ~4 MiB f32 blocks (2 MiB on v5e); double-buffered 2 inputs <= 16 MiB VMEM.
        tile_rows_target = 4096 if "v5" in kind else 8192

    min_rows = max(_min_sublane_rows(x.dtype), _min_sublane_rows(target.dtype))

    x_flat = x.reshape(-1)
    t_flat = target.reshape(-1)

    rows = n_elem // _LANES
    if rows < min_rows:
        rows = 0  # too tiny for a sensible tile; plain-JAX path handles everything
    n_main = rows * _LANES
    tail_n = n_elem - n_main

    main_sum = jnp.float32(0.0)
    if rows > 0:
        if n_main == n_elem:
            # Zero-copy: reshape of a contiguous array is a bitcast in XLA.
            x2 = x_flat.reshape(rows, _LANES)
            t2 = t_flat.reshape(rows, _LANES)
        else:
            # TODO(synk): this static slice forces one HBM copy of the inputs; a
            # fully copy-free ragged path would need memory_space=pl.ANY + manual DMA.
            x2 = x_flat[:n_main].reshape(rows, _LANES)
            t2 = t_flat[:n_main].reshape(rows, _LANES)

        per_split_rows = _cdiv(rows, num_splits)
        tile_rows = max(min_rows,
                        min(tile_rows_target,
                            (per_split_rows // min_rows) * min_rows))
        total_blocks = _cdiv(rows, tile_rows)
        num_splits = max(1, min(num_splits, total_blocks))
        steps = _cdiv(total_blocks, num_splits)
        chunk_rows = math.gcd(tile_rows, 64)  # multiple of min_rows, divides tile_rows
        assert tile_rows % chunk_rows == 0
        mask_needed = (num_splits * steps * tile_rows) > rows

        def _block_index(c, i):
            b = c * steps + i
            if num_splits * steps > total_blocks:
                # Grid positions past the last real block re-read the last block;
                # the in-kernel row mask zeroes their contribution.
                b = jnp.minimum(b, total_blocks - 1)
            return (b, 0)

        kernel = functools.partial(
            _mse_partial_kernel,
            rows=rows, tile_rows=tile_rows, chunk_rows=chunk_rows,
            steps=steps, mask_needed=mask_needed)

        out_bytes = num_splits * _SUBLANES * _LANES * 4
        partials = pl.pallas_call(
            kernel,
            out_shape=jax.ShapeDtypeStruct((num_splits, _SUBLANES, _LANES),
                                           jnp.float32),
            grid_spec=pltpu.PrefetchScalarGridSpec(
                num_scalar_prefetch=0,
                grid=(num_splits, steps),
                in_specs=[
                    pl.BlockSpec((tile_rows, _LANES), _block_index),
                    pl.BlockSpec((tile_rows, _LANES), _block_index),
                ],
                out_specs=pl.BlockSpec((1, _SUBLANES, _LANES),
                                       lambda c, i: (c, 0, 0)),
            ),
            compiler_params=pltpu.CompilerParams(
                dimension_semantics=("parallel", "arbitrary"),
                vmem_limit_bytes=40 * 1024 * 1024,
            ),
            cost_estimate=pl.CostEstimate(
                flops=3 * n_main,
                transcendentals=0,
                bytes_accessed=int(x2.nbytes) + int(t2.nbytes) + out_bytes,
            ),
        )(x2, t2)

        # One tiny cross-lane reduce outside the hot loop.
        main_sum = jnp.sum(partials)

    tail_sum = jnp.float32(0.0)
    if tail_n > 0:
        xt = x_flat[n_main:].astype(jnp.float32)
        tt = t_flat[n_main:].astype(jnp.float32)
        dt = xt - tt
        tail_sum = jnp.sum(dt * dt)

    cw = jnp.asarray(content_weight, jnp.float32)
    loss = (cw * cw) * (main_sum + tail_sum) / jnp.float32(n_elem)
    return x, loss  # ContentLoss.forward returns the input unchanged


class ContentLoss:
    """JAX/Pallas analogue of the PyTorch ContentLoss module (forward only)."""

    def __init__(self, target, content_weight, *, quantize_target_bf16=False):
        self.content_weight = content_weight
        # Keep the UNSCALED target; cw^2 is folded into the scalar epilogue.
        self.target = lax.stop_gradient(target)
        if quantize_target_bf16:
            # Optional: stream the constant target at 6 B/elem total instead of 8.
            self.target = self.target.astype(jnp.bfloat16)
        self.loss = None
        self.output = None

    def __call__(self, input_data):
        self.output, self.loss = content_loss_forward(
            input_data, self.target, self.content_weight)
        return self.output


if __name__ == "__main__":
    key = jax.random.PRNGKey(0)
    k_x, k_t = jax.random.split(key)

    B, C, H, W = 2, 4, 16, 16  # NCHW, matching PyTorch conv-feature layout
    content_weight = 0.75

    x = jax.random.normal(k_x, (B, C, H, W), dtype=jnp.float32)
    target = jax.random.normal(k_t, (B, C, H, W), dtype=jnp.float32)

    module = ContentLoss(target, content_weight)
    output = jax.block_until_ready(module(x))
    loss = jax.block_until_ready(module.loss)

    # Reference check (plain JAX), mirroring the PyTorch module exactly.
    target_scaled = target * content_weight
    ref_loss = jnp.mean((x * content_weight - target_scaled) ** 2)
    assert output.shape == x.shape and output.dtype == x.dtype
    assert bool(jnp.allclose(output, x))
    assert bool(jnp.allclose(loss, ref_loss, rtol=1e-5, atol=1e-6)), (loss, ref_loss)

    # Second check: ragged size exercising the in-kernel row mask + wrapper tail.
    k_x2, k_t2 = jax.random.split(k_t)
    x_r = jax.random.normal(k_x2, (2, 3, 15, 17), dtype=jnp.float32)
    t_r = jax.random.normal(k_t2, (2, 3, 15, 17), dtype=jnp.float32)
    module_r = ContentLoss(t_r, 1.25)
    out_r = jax.block_until_ready(module_r(x_r))
    loss_r = jax.block_until_ready(module_r.loss)
    ref_r = jnp.mean((x_r * 1.25 - t_r * 1.25) ** 2)
    assert bool(jnp.allclose(out_r, x_r))
    assert bool(jnp.allclose(loss_r, ref_r, rtol=1e-5, atol=1e-6)), (loss_r, ref_r)

    print("KERNEL_OK")
</pallas_src>

<mosaic_0001>
module attributes {stable_mosaic.version = 11 : i64} {
  func.func @_mse_partial_kernel(%arg0: i32, %arg1: i32, %arg2: memref<16x128xf32, #tpu.memory_space<vmem>>, %arg3: memref<16x128xf32, #tpu.memory_space<vmem>>, %arg4: memref<1x8x128xf32, #tpu.memory_space<vmem>>) attributes {dimension_semantics = [#tpu.dimension_semantics<parallel>, #tpu.dimension_semantics<arbitrary>], iteration_bounds = array<i64: 1, 1>, scalar_prefetch = 0 : i64, scratch_operands = 0 : i64, tpu.core_type = #tpu.core_type<tc>, window_params = [{transform_indices = @transform_0, window_bounds = array<i64: 16, 128>}, {transform_indices = @transform_1, window_bounds = array<i64: 16, 128>}, {transform_indices = @transform_2, window_bounds = array<i64: 1, 8, 128>}]} {
    %cst = arith.constant 0.000000e+00 : f32
    %0 = vector.broadcast %cst : f32 to vector<8x128xf32>
    %c0 = arith.constant 0 : index
    %c0_0 = arith.constant 0 : index
    %1 = vector.load %arg2[%c0, %c0_0] : memref<16x128xf32, #tpu.memory_space<vmem>>, vector<16x128xf32>
    %c0_1 = arith.constant 0 : index
    %c0_2 = arith.constant 0 : index
    %2 = vector.load %arg3[%c0_1, %c0_2] : memref<16x128xf32, #tpu.memory_space<vmem>>, vector<16x128xf32>
    %3 = arith.subf %1, %2 : vector<16x128xf32>
    %4 = arith.mulf %3, %3 : vector<16x128xf32>
    %5 = vector.shape_cast %4 : vector<16x128xf32> to vector<2x8x128xf32>
    %cst_3 = arith.constant dense<0.000000e+00> : vector<8x128xf32>
    %6 = vector.multi_reduction <add>, %5, %cst_3 [0] : vector<2x8x128xf32> to vector<8x128xf32>
    %7 = arith.addf %0, %6 : vector<8x128xf32>
    %c0_i32 = arith.constant 0 : i32
    %8 = arith.cmpi eq, %arg1, %c0_i32 : i32
    %9 = arith.extui %8 : i1 to i32
    %c0_i32_4 = arith.constant 0 : i32
    %10 = arith.cmpi ne, %9, %c0_i32_4 : i32
    scf.if %10 {
      %14 = vector.shape_cast %7 : vector<8x128xf32> to vector<1x8x128xf32>
      %c0_7 = arith.constant 0 : index
      %c0_8 = arith.constant 0 : index
      %c0_9 = arith.constant 0 : index
      %15 = vector.load %arg4[%c0_7, %c0_8, %c0_9] : memref<1x8x128xf32, #tpu.memory_space<vmem>>, vector<1x8x128xf32>
      tpu.vector_store %arg4[%c0_7, %c0_8, %c0_9], %14 {strides = array<i32>} : memref<1x8x128xf32, #tpu.memory_space<vmem>>, vector<1x8x128xf32>,
    } else {
    }
    %c0_i32_5 = arith.constant 0 : i32
    %11 = arith.cmpi sgt, %arg1, %c0_i32_5 : i32
    %12 = arith.extui %11 : i1 to i32
    %c0_i32_6 = arith.constant 0 : i32
    %13 = arith.cmpi ne, %12, %c0_i32_6 : i32
    scf.if %13 {
      %c0_7 = arith.constant 0 : index
      %c0_8 = arith.constant 0 : index
      %c0_9 = arith.constant 0 : index
      %14 = vector.load %arg4[%c0_7, %c0_8, %c0_9] : memref<1x8x128xf32, #tpu.memory_space<vmem>>, vector<1x8x128xf32>
      %15 = vector.shape_cast %7 : vector<8x128xf32> to vector<1x8x128xf32>
      %16 = arith.addf %14, %15 : vector<1x8x128xf32>
      %c0_10 = arith.constant 0 : index
      %c0_11 = arith.constant 0 : index
      %c0_12 = arith.constant 0 : index
      %17 = vector.load %arg4[%c0_10, %c0_11, %c0_12] : memref<1x8x128xf32, #tpu.memory_space<vmem>>, vector<1x8x128xf32>
      tpu.vector_store %arg4[%c0_10, %c0_11, %c0_12], %16 {strides = array<i32>} : memref<1x8x128xf32, #tpu.memory_space<vmem>>, vector<1x8x128xf32>,
    } else {
    }
    return
  }
  func.func @transform_0(%arg0: i32, %arg1: i32) -> (i32, i32) {
    %c1_i32 = arith.constant 1 : i32
    %0 = arith.muli %arg0, %c1_i32 : i32
    %1 = arith.addi %0, %arg1 : i32
    %c0_i32 = arith.constant 0 : i32
    %c0_i32_0 = arith.constant 0 : i32
    return %1, %c0_i32 : i32, i32
  }
  func.func @transform_1(%arg0: i32, %arg1: i32) -> (i32, i32) {
    %c1_i32 = arith.constant 1 : i32
    %0 = arith.muli %arg0, %c1_i32 : i32
    %1 = arith.addi %0, %arg1 : i32
    %c0_i32 = arith.constant 0 : i32
    %c0_i32_0 = arith.constant 0 : i32
    return %1, %c0_i32 : i32, i32
  }
  func.func @transform_2(%arg0: i32, %arg1: i32) -> (i32, i32, i32) {
    %c0_i32 = arith.constant 0 : i32
    %c0_i32_0 = arith.constant 0 : i32
    %c0_i32_1 = arith.constant 0 : i32
    return %arg0, %c0_i32, %c0_i32_0 : i32, i32, i32
  }
}

</mosaic_0001>

<bundles_post_ra>
// kernel: tpu_custom_call.1
= control target key start
LH: loop header
LB: loop body
LE: loop exit
PB: predicated region body
PF: predicated region fallthrough
CT: control target
= control target key end

     0   :  { %7 = vsyncpa [#allocation3], 0  ;;  %s190_s0 = inlined_call_operand.hbm [shape: f32[16,128], index: 0, kind: input, shape index: {}]   ;;  %s191_s1 = inlined_call_operand.hbm [shape: f32[16,128], index: 1, kind: input, shape index: {}]   ;;  %s192_s2 = inlined_call_operand.hbm [shape: f32[1,8,128], index: 2, kind: output, shape index: {}]  }
   0x1   :  { %8 = vsyncpa [#allocation6], 0 }
   0x2   :  { %9 = vsyncpa [#allocation4], 0  ;;  %s161_s9 = smov [#allocation2]  }
   0x3   :  { %s19_s10 = sshll.u32 %s161_s9, 4  ;;  %s20_s10 = int_to_ptr.vmem [resolvable:$true] %s19_s10 }
   0x4   :  { %s103_s11 = scalar_lea.vmem %s20_s10, 256  ;;  %p108_p1 = scmp.lt.s32.totalorder %s20_s10, %s20_s10 }
   0x5   :  { %p104_p0 = scmp.ne.s32.totalorder %s20_s10, %s103_s11  ;;  %p109_p2 = scmp.lt.s32.totalorder %s103_s11, %s103_s11 }
   0x7   :  { %p110_p3 = por %p109_p2, %p108_p1 }
   0x9   :  { %p111_p4 = pnand %p110_p3, %p104_p0 }
   0xb   :  { %114 = shalt.err (!%p111_p4)
}
   0xc   :  { %s162_s12 = smov 128   ;;  %s163_s13 = smov 8  }
   0xd   :  { %25 = dma.hbm_to_vmem [thread:$0]  %s190_s0, 256, %s20_s10, [#allocation3], %s162_s12, %s162_s12, %s163_s13  }
   0xe   :  { %s164_s16 = smov [#allocation5]  }
   0xf   :  { %s35_s17 = sshll.u32 %s164_s16, 4  ;;  %s36_s17 = int_to_ptr.vmem [resolvable:$true] %s35_s17 }
  0x10   :  { %s123_s18 = scalar_lea.vmem %s36_s17, 256  ;;  %p128_p6 = scmp.lt.s32.totalorder %s36_s17, %s36_s17 }
  0x11   :  { %p124_p5 = scmp.ne.s32.totalorder %s36_s17, %s123_s18  ;;  %p129_p7 = scmp.lt.s32.totalorder %s123_s18, %s123_s18 }
  0x13   :  { %p130_p8 = por %p129_p7, %p128_p6 }
  0x15   :  { %p131_p9 = pnand %p130_p8, %p124_p5 }
  0x17   :  { %134 = shalt.err (!%p131_p9)
}
  0x18   :  { %41 = dma.hbm_to_vmem [thread:$0]  %s191_s1, 256, %s36_s17, [#allocation6], %s162_s12, %s162_s12, %s163_s13  }
  0x19   :  { %155 = dma.done.wait [#allocation3], 256  }
  0x1a   :  { %156 = vsyncadd [#allocation3], 4294967040 }
  0x1b   :  { %157 = dma.done.wait [#allocation6], 256  }
  0x1c   :  { %158 = vsyncadd [#allocation6], 4294967040  ;;  %v52_v0 = vld [vmem:[#allocation2] sm:$0xff]  ;;  %v53_v1 = vld [vmem:[#allocation2 + $0x8] sm:$0xff]  ;;  %s165_s0 = smov [#allocation7]  }
  0x1d   :  { %v54_v2 = vld [vmem:[#allocation5] sm:$0xff]  ;;  %v55_v3 = vld [vmem:[#allocation5 + $0x8] sm:$0xff]  ;;  %s80_s21 = sshll.u32 %s165_s0, 4  ;;  %s81_s21 = int_to_ptr.vmem [resolvable:$true] %s80_s21 }
  0x1e   :  { %v56_v4 = vsub.f32 %v52_v0, %v54_v2  ;;  %v57_v5 = vsub.f32 %v53_v1, %v55_v3  ;;  %s135_s22 = scalar_lea.vmem %s81_s21, 128  ;;  %p140_p11 = scmp.lt.s32.totalorder %s81_s21, %s81_s21 }
  0x1f   :  { %p136_p10 = scmp.ne.s32.totalorder %s81_s21, %s135_s22  ;;  %p141_p12 = scmp.lt.s32.totalorder %s135_s22, %s135_s22 }
  0x20   :  { %v58_v6 = vmul.f32 %v56_v4, %v56_v4  ;;  %v59_v7 = vmul.f32 %v57_v5, %v57_v5 }
  0x21   :  { %p142_p13 = por %p141_p12, %p140_p11 }
  0x22   :  { %v60_v8 = vadd.f32 %v59_v7, %v58_v6 }
  0x23   :  { %p143_p0 = pnand %p142_p13, %p136_p10 }
  0x24   :  { %66 = vst [vmem:[#allocation7] sm:$0xff] %v60_v8 }
  0x25   :  { %146 = shalt.err (!%p143_p0)
}
  0x26   :  { %83 = dma.vmem_to_hbm [thread:$0]  %s81_s21, 128, %s192_s2, [#allocation4]  }
  0x27   :  { %159 = dma.done.wait [#allocation4], 128  }
  0x28   :  { %160 = vsyncadd [#allocation4], 4294967168 }
  0x29   :  { %87 = vsyncpa [#allocation3], 1 }
  0x2a   :  { %88 = vsyncpa [#allocation6], 1 }
  0x2b   :  { %89 = vsyncpa [#allocation4], 1 }

</bundles_post_ra>
